<compile_context>
chip_gen: v7x
topology: tpu7x:2x2x1
jax: 0.10.0
libtpu: 0.0.40
codegen_flags: <defaults>
</compile_context>

<pallas_src>
import jax
import jax.numpy as jnp
from jax.experimental import pallas as pl
from jax.experimental.pallas import tpu as pltpu


def normalize_kernel(mean_ref, inv_sd_ref, x_ref, o_ref):
    # mean_ref / inv_sd_ref: VMEM blocks of shape (TM, 1)
    # x_ref / o_ref:         VMEM blocks of shape (TM, H*W)
    x = x_ref[...]
    m = mean_ref[...].astype(x.dtype)        # (TM, 1) -> lane broadcast
    inv_s = inv_sd_ref[...].astype(x.dtype)  # (TM, 1) -> lane broadcast
    o_ref[...] = ((x - m) * inv_s).astype(o_ref.dtype)


def _choose_row_tile(rows: int, cols: int, itemsize: int,
                     target_bytes: int = 2 * 1024 * 1024) -> int:
    """Pick a row-tile TM so one (TM, cols) block is ~target_bytes.

    TM must be a multiple of 8 or equal to the full row extent (TPU sublane
    constraint). ~2 MiB blocks keep double-buffered in+out well under the
    default scoped VMEM limit on every generation (v5e 16 MiB, v7x 32 MiB).
    """
    if rows <= 8:
        return rows
    tm = (target_bytes // max(1, cols * itemsize)) // 8 * 8
    tm = max(8, tm)
    if tm >= rows:
        return rows          # full extent: always legal
    return tm                # multiple of 8; partial edge block is masked by Pallas


def normalize_layer(x: jax.Array, means: jax.Array, sds: jax.Array) -> jax.Array:
    """(x - means[c]) / sds[c], broadcast over batch and spatial dims (NCHW)."""
    B, C, H, W = x.shape
    rows = B * C
    cols = H * W

    # Per-(b, c)-row statistics; reciprocal computed once on the host so the
    # kernel only does a subtract + multiply.
    means_f32 = means.astype(jnp.float32)
    inv_sds_f32 = (1.0 / sds.astype(jnp.float32))
    mean_rows = jnp.tile(means_f32, B).reshape(rows, 1).astype(x.dtype)
    inv_sd_rows = jnp.tile(inv_sds_f32, B).reshape(rows, 1).astype(x.dtype)

    x2 = x.reshape(rows, cols)

    tm = _choose_row_tile(rows, cols, x.dtype.itemsize)
    grid = (pl.cdiv(rows, tm),)

    out = pl.pallas_call(
        normalize_kernel,
        out_shape=jax.ShapeDtypeStruct((rows, cols), x.dtype),
        grid=grid,
        in_specs=[
            pl.BlockSpec((tm, 1), lambda i: (i, 0)),      # per-row means
            pl.BlockSpec((tm, 1), lambda i: (i, 0)),      # per-row 1/sd
            pl.BlockSpec((tm, cols), lambda i: (i, 0)),   # lane-dense data block
        ],
        out_specs=pl.BlockSpec((tm, cols), lambda i: (i, 0)),
        compiler_params=pltpu.CompilerParams(
            dimension_semantics=("parallel",)
        ),
    )(mean_rows, inv_sd_rows, x2)

    return out.reshape(B, C, H, W)


if __name__ == "__main__":
    # Deterministic "dataset statistics" (synthetic, 4 channels).
    means_list = [0.4914, 0.4822, 0.4465, 0.5000]
    sds_list = [0.2023, 0.1994, 0.2010, 0.2500]

    means = jnp.asarray(means_list, dtype=jnp.float32)
    sds = jnp.asarray(sds_list, dtype=jnp.float32)

    # Small NCHW input consistent with the module's forward.
    key = jax.random.PRNGKey(0)
    x = jax.random.normal(key, (2, 4, 16, 16), dtype=jnp.float32)

    out = normalize_layer(x, means, sds)
    out = jax.block_until_ready(out)

    # Reference check against plain JAX broadcasting semantics.
    ref = (x - means[None, :, None, None]) / sds[None, :, None, None]
    assert out.shape == x.shape
    assert jnp.allclose(out, ref, atol=1e-6, rtol=1e-6)

    print("KERNEL_OK")
</pallas_src>

<mosaic_0001>
module attributes {stable_mosaic.version = 11 : i64} {
  func.func @normalize_kernel(%arg0: i32, %arg1: memref<8x1xf32, #tpu.memory_space<vmem>>, %arg2: memref<8x1xf32, #tpu.memory_space<vmem>>, %arg3: memref<8x256xf32, #tpu.memory_space<vmem>>, %arg4: memref<8x256xf32, #tpu.memory_space<vmem>>) attributes {dimension_semantics = [#tpu.dimension_semantics<parallel>], iteration_bounds = array<i64: 1>, scalar_prefetch = 0 : i64, scratch_operands = 0 : i64, tpu.core_type = #tpu.core_type<tc>, window_params = [{transform_indices = @transform_0, window_bounds = array<i64: 8, 1>}, {transform_indices = @transform_1, window_bounds = array<i64: 8, 1>}, {transform_indices = @transform_2, window_bounds = array<i64: 8, 256>}, {transform_indices = @transform_3, window_bounds = array<i64: 8, 256>}]} {
    %c0 = arith.constant 0 : index
    %c0_0 = arith.constant 0 : index
    %0 = vector.load %arg3[%c0, %c0_0] : memref<8x256xf32, #tpu.memory_space<vmem>>, vector<8x256xf32>
    %c0_1 = arith.constant 0 : index
    %c0_2 = arith.constant 0 : index
    %1 = vector.load %arg1[%c0_1, %c0_2] : memref<8x1xf32, #tpu.memory_space<vmem>>, vector<8x1xf32>
    %c0_3 = arith.constant 0 : index
    %c0_4 = arith.constant 0 : index
    %2 = vector.load %arg2[%c0_3, %c0_4] : memref<8x1xf32, #tpu.memory_space<vmem>>, vector<8x1xf32>
    %3 = vector.broadcast %1 : vector<8x1xf32> to vector<8x256xf32>
    %4 = arith.subf %0, %3 : vector<8x256xf32>
    %5 = vector.broadcast %2 : vector<8x1xf32> to vector<8x256xf32>
    %6 = arith.mulf %4, %5 : vector<8x256xf32>
    %c0_5 = arith.constant 0 : index
    %c0_6 = arith.constant 0 : index
    %7 = vector.load %arg4[%c0_5, %c0_6] : memref<8x256xf32, #tpu.memory_space<vmem>>, vector<8x256xf32>
    tpu.vector_store %arg4[%c0_5, %c0_6], %6 {strides = array<i32>} : memref<8x256xf32, #tpu.memory_space<vmem>>, vector<8x256xf32>,
    return
  }
  func.func @transform_0(%arg0: i32) -> (i32, i32) {
    %c0_i32 = arith.constant 0 : i32
    %c0_i32_0 = arith.constant 0 : i32
    return %arg0, %c0_i32 : i32, i32
  }
  func.func @transform_1(%arg0: i32) -> (i32, i32) {
    %c0_i32 = arith.constant 0 : i32
    %c0_i32_0 = arith.constant 0 : i32
    return %arg0, %c0_i32 : i32, i32
  }
  func.func @transform_2(%arg0: i32) -> (i32, i32) {
    %c0_i32 = arith.constant 0 : i32
    %c0_i32_0 = arith.constant 0 : i32
    return %arg0, %c0_i32 : i32, i32
  }
  func.func @transform_3(%arg0: i32) -> (i32, i32) {
    %c0_i32 = arith.constant 0 : i32
    %c0_i32_0 = arith.constant 0 : i32
    return %arg0, %c0_i32 : i32, i32
  }
}

</mosaic_0001>

<bundles_post_ra>
// kernel: tpu_custom_call.1
= control target key start
LH: loop header
LB: loop body
LE: loop exit
PB: predicated region body
PF: predicated region fallthrough
CT: control target
= control target key end

     0   :  { %s122_s0 = inlined_call_operand.vmem [shape: f32[8,1], index: 0, kind: input, shape index: {}]   ;;  %s123_s1 = inlined_call_operand.vmem [shape: f32[8,1], index: 1, kind: input, shape index: {}]   ;;  %s124_s2 = inlined_call_operand.vmem [shape: f32[8,256], index: 2, kind: input, shape index: {}]   ;;  %s125_s3 = inlined_call_operand.hbm [shape: f32[8,256], index: 3, kind: output, shape index: {}]  }
   0x1   :  { %v17_v0 = vld [vmem:[%s122_s0] sm:$0xff] }
   0x2   :  { %8 = vsyncpa [#allocation3], 0  ;;  %v76_v1 = vmov 0   ;;  %v18_v2 = vld [vmem:[%s123_s1] sm:$0xff]  ;;  %v16_v5 = vld [vmem:[%s124_s2 + $0x8] sm:$0xff]  ;;  %s77_s20 = smov [#allocation2]  }
   0x3   :  { %51 = vset.pattern.permute.xlu0 %v76_v1  ;;  %v15_v4 = vld [vmem:[%s124_s2] sm:$0xff]  ;;  %s41_s0 = sshll.u32 %s77_s20, 4  ;;  %s42_s0 = int_to_ptr.vmem [resolvable:$true] %s41_s0 }
   0x4   :  { %21 = vperm.xlu0 %51, %v17_v0   ;;  %s52_s1 = scalar_lea.vmem %s42_s0, 256  ;;  %p57_p1 = scmp.lt.s32.totalorder %s42_s0, %s42_s0 }
   0x5   :  { %p53_p0 = scmp.ne.s32.totalorder %s42_s0, %s52_s1  ;;  %p58_p2 = scmp.lt.s32.totalorder %s52_s1, %s52_s1 }
   0x7   :  { %p59_p3 = por %p58_p2, %p57_p1 }
   0x8   :  { %28 = vperm.xlu0 %51, %v18_v2  }
   0x9   :  { %p60_p4 = pnand %p59_p3, %p53_p0 }
  0x83   :  { %v22_v3 = vpop.permute.xlu0 %21 }
  0x84   :  { %v24_v6 = vsub.f32 %v15_v4, %v22_v3  ;;  %v25_v7 = vsub.f32 %v16_v5, %v22_v3 }
  0x87   :  { %v29_v8 = vpop.permute.xlu0 %28 }
  0x88   :  { %v31_v9 = vmul.f32 %v29_v8, %v24_v6  ;;  %v32_v10 = vmul.f32 %v29_v8, %v25_v7 }
  0x8a   :  { %33 = vst [vmem:[#allocation2] sm:$0xff] %v31_v9  ;;  %34 = vst [vmem:[#allocation2 + $0x8] sm:$0xff] %v32_v10 }
  0x8b   :  { %63 = shalt.err (!%p60_p4)
}
  0x8c   :  { %s64_s2 = scalar_lea.hbm %s125_s3, 256 }
  0x8d   :  { %p65_p5 = scmp.ne.s32.totalorder %s125_s3, %s64_s2  ;;  %p68_p6 = scmp.lt.u32.totalorder %s64_s2, %s125_s3 }
  0x8f   :  { %p70_p7 = pnand %p68_p6, %p65_p5 }
  0x91   :  { %73 = shalt.err (!%p70_p7)
}
  0x92   :  { %44 = dma.vmem_to_hbm [thread:$0]  %s42_s0, 256, %s125_s3, [#allocation3]  }
  0x93   :  { %74 = dma.done.wait [#allocation3], 256  }
  0x94   :  { %75 = vsyncadd [#allocation3], 4294967040 }
  0x95   :  { %48 = vsyncpa [#allocation3], 1 }

</bundles_post_ra>
